<compile_context>
chip_gen: v6e
topology: v6e:2x2x1
jax: 0.10.0
libtpu: 0.0.40
codegen_flags: <defaults>
</compile_context>

<pallas_src>
import functools

import jax
import jax.numpy as jnp
from jax import lax
from jax.experimental import pallas as pl
from jax.experimental.pallas import tpu as pltpu

LANES = 128
SUBLANES = 8
ACC_ROWS = 4 * SUBLANES                     # 4 independent accumulation chains
_TARGET_BLOCK_BYTES = 4 * 1024 * 1024       # per-input per-step DMA block
_BIG_VMEM_BLOCK_BYTES = 8 * 1024 * 1024     # on >=96 MiB VMEM chips (v5e/v6e)
_VMEM_LIMIT_BYTES = 64 * 1024 * 1024


def _tpu_info():
    try:
        return pltpu.get_tpu_info()
    except Exception:
        return None


def _num_tensorcores() -> int:
    info = _tpu_info()
    if info is None:
        return 1
    for attr in ("num_cores", "core_count", "num_tensorcores",
                 "tensorcores_per_chip", "cores_per_chip"):
        v = getattr(info, attr, None)
        if isinstance(v, int) and 1 <= v <= 16:
            return v
    return 1


def _vmem_capacity_bytes() -> int:
    info = _tpu_info()
    if info is None:
        return 0
    for attr in ("vmem_capacity_bytes", "vmem_bytes", "vmem_size_bytes"):
        v = getattr(info, attr, None)
        if isinstance(v, int) and v > 0:
            return v
    return 0


def _allow_nan_sq_sum_kernel(pred_ref, true_ref, out_ref, acc_ref, *,
                             has_nan: str, tm: int, per_core: int,
                             m_valid: int, needs_mask: bool):
    c = pl.program_id(0)          # TensorCore slice (parallel / core-parallel)
    i = pl.program_id(1)          # reduction step within the slice

    @pl.when(i == 0)
    def _init():
        acc_ref[...] = jnp.zeros_like(acc_ref)

    p = pred_ref[...].astype(jnp.float32)
    t = true_ref[...].astype(jnp.float32)

    # NaN handling, exactly like the PyTorch module: wherever the mask is true,
    # BOTH operands are replaced by 0, so the difference is 0.  One fused select
    # per element.  NaNs in the *unmasked* operand intentionally propagate
    # (matching the torch composition for 'left'/'right').
    if has_nan == "both":
        bad = jnp.isnan(p) | jnp.isnan(t)
    elif has_nan == "left":
        bad = jnp.isnan(p)
    elif has_nan == "right":
        bad = jnp.isnan(t)
    else:
        raise ValueError(f"Unknown has_nan: {has_nan}")
    d = jnp.where(bad, 0.0, p - t)
    dd = d * d

    def accumulate(vals):
        # Pure elementwise accumulation into a vreg-shaped accumulator; the
        # (ACC_ROWS, LANES) shape gives ACC_ROWS // 8 independent add chains.
        if tm % ACC_ROWS == 0:
            acc_ref[...] = acc_ref[...] + vals.reshape(
                tm // ACC_ROWS, ACC_ROWS, LANES).sum(axis=0)
        elif tm % SUBLANES == 0:
            acc_ref[0:SUBLANES, :] = acc_ref[0:SUBLANES, :] + vals.reshape(
                tm // SUBLANES, SUBLANES, LANES).sum(axis=0)
        else:
            # Tiny-input fallback (tm == M < 8 rows or irregular row count).
            acc_ref[0:1, :] = acc_ref[0:1, :] + jnp.sum(
                vals, axis=0, keepdims=True)

    if needs_mask:
        # Some grid steps cover rows >= m_valid (ragged last block or
        # over-covered clamped blocks).  Only those steps pay for the row
        # mask; interior blocks take the unmasked fast path (pl.when gate).
        logical_block = c * per_core + i
        is_edge = (logical_block + 1) * tm > m_valid

        @pl.when(jnp.logical_not(is_edge))
        def _interior():
            accumulate(dd)

        @pl.when(is_edge)
        def _edge():
            row = logical_block * tm + lax.broadcasted_iota(
                jnp.int32, (tm, LANES), 0)
            # Keep this a select (not a multiply) and AFTER the NaN handling /
            # square: clamped / padded regions may hold NaN garbage that must
            # not propagate into the accumulator.
            accumulate(jnp.where(row < m_valid, dd, 0.0))
    else:
        accumulate(dd)

    @pl.when(i == pl.num_programs(1) - 1)
    def _finalize():
        out_ref[...] = acc_ref[...].reshape(1, ACC_ROWS, LANES)


def allow_nan_mse(y_pred: jax.Array, y_true: jax.Array, *,
                  has_nan: str = "both", max_rows: int | None = None) -> jax.Array:
    """AllowNan(nn.MSELoss())(y_pred, y_true) -> scalar f32 loss."""
    if has_nan not in ("both", "left", "right"):
        raise ValueError(f"Unknown has_nan: {has_nan}")
    assert y_pred.shape == y_true.shape, (y_pred.shape, y_true.shape)

    total = int(y_pred.size)
    if total == 0:
        # Mean over zero elements (0/0) -> NaN, matching torch MSELoss('mean').
        return jnp.float32(jnp.nan)

    # The kernel computes in f32; keep narrow floats native (cast per-block on
    # the VPU), everything else goes through f32 up front.
    def _prep(x):
        if x.dtype in (jnp.float32, jnp.bfloat16, jnp.float16):
            return x
        return x.astype(jnp.float32)
    y_pred = _prep(y_pred)
    y_true = _prep(y_true)

    flat_p = jnp.ravel(y_pred)
    flat_t = jnp.ravel(y_true)

    # Lane-dense (M, 128) view.  When total % 128 == 0 (the common case) this is
    # a free reshape and NO copy is made.  Otherwise the (<128-element) tail is
    # zero-padded (zero contribution to the squared-error sum).
    # TODO(synk): a fully copy-free ragged tail needs 1-D VMEM blocks; kept on
    # the padded 2-D path to stay within well-supported (8,128) layouts.
    rem = total % LANES
    if rem:
        pad = LANES - rem
        flat_p = jnp.pad(flat_p, (0, pad))
        flat_t = jnp.pad(flat_t, (0, pad))
    M = flat_p.shape[0] // LANES
    x_p = flat_p.reshape(M, LANES)
    x_t = flat_t.reshape(M, LANES)

    itemsize = max(jnp.dtype(x_p.dtype).itemsize, jnp.dtype(x_t.dtype).itemsize)

    # Per-generation tile: ~4 MiB per input per step (8 MiB on big-VMEM chips),
    # scaled so sub-32-bit dtypes keep constant bytes per step.
    block_bytes = _TARGET_BLOCK_BYTES
    if _vmem_capacity_bytes() >= 96 * 1024 * 1024:
        block_bytes = _BIG_VMEM_BLOCK_BYTES
    max_tm = max(ACC_ROWS,
                 (block_bytes // (LANES * itemsize)) // ACC_ROWS * ACC_ROWS)
    if max_rows is not None:
        max_tm = max(1, int(max_rows))
    tm = min(max_tm, M)
    n_blocks = pl.cdiv(M, tm)

    def _run(num_slices, dim_sem):
        per_core = pl.cdiv(n_blocks, num_slices)
        needs_mask = (num_slices * per_core * tm) != M

        def in_map(c, i):
            # Clamp so over-covering slices still read valid memory; their
            # contribution is zeroed by the in-kernel edge mask.
            return (jnp.minimum(c * per_core + i, n_blocks - 1), 0)

        kernel = functools.partial(
            _allow_nan_sq_sum_kernel, has_nan=has_nan, tm=tm,
            per_core=per_core, m_valid=M, needs_mask=needs_mask)

        cost = pl.CostEstimate(
            flops=6 * total, transcendentals=0,
            bytes_accessed=2 * total * int(itemsize)
                           + num_slices * ACC_ROWS * LANES * 4)

        return pl.pallas_call(
            kernel,
            out_shape=jax.ShapeDtypeStruct((num_slices, ACC_ROWS, LANES),
                                           jnp.float32),
            grid_spec=pltpu.PrefetchScalarGridSpec(
                num_scalar_prefetch=0,
                grid=(num_slices, per_core),
                in_specs=[pl.BlockSpec((tm, LANES), in_map),
                          pl.BlockSpec((tm, LANES), in_map)],
                out_specs=pl.BlockSpec((1, ACC_ROWS, LANES),
                                       lambda c, i: (c, 0, 0)),
                scratch_shapes=[pltpu.VMEM((ACC_ROWS, LANES), jnp.float32)]),
            compiler_params=pltpu.CompilerParams(
                dimension_semantics=dim_sem,
                vmem_limit_bytes=_VMEM_LIMIT_BYTES),
            cost_estimate=cost,
        )(x_p, x_t)

    # Split the reduction across TensorCores only when the chip has more than
    # one AND there is enough work to amortise the duplicated edge block.
    num_cores = _num_tensorcores()
    use_slices = num_cores if (num_cores > 1 and n_blocks >= 2 * num_cores) else 1

    if use_slices > 1:
        core_par = getattr(pltpu, "CORE_PARALLEL", None)
        if core_par is not None:
            dim_sem = (core_par, getattr(pltpu, "ARBITRARY", "arbitrary"))
        else:
            dim_sem = ("parallel", "arbitrary")
        try:
            partials = _run(use_slices, dim_sem)
        except Exception:
            # Defensive fallback for chips where core-parallel lowering differs.
            partials = _run(1, ("arbitrary", "arbitrary"))
    else:
        partials = _run(1, ("arbitrary", "arbitrary"))

    # Final tiny cross-lane/sublane reduce done in XLA.
    return jnp.sum(partials) / jnp.float32(total)


def _reference(y_pred, y_true, has_nan="both"):
    p = y_pred.astype(jnp.float32)
    t = y_true.astype(jnp.float32)
    if has_nan == "both":
        m = jnp.isnan(p) | jnp.isnan(t)
    elif has_nan == "left":
        m = jnp.isnan(p)
    else:
        m = jnp.isnan(t)
    p = jnp.where(m, 0.0, p)
    t = jnp.where(m, 0.0, t)
    return jnp.mean((p - t) ** 2)


if __name__ == "__main__":
    key = jax.random.PRNGKey(0)
    k = jax.random.split(key, 10)

    ok = True

    def check(got, want, equal_nan=False):
        got = jax.block_until_ready(got)
        return bool(jnp.allclose(got, want, rtol=1e-5, atol=1e-6,
                                 equal_nan=equal_nan))

    # Case 1: small NCHW tensors with NaNs in both args, all three modes.
    shape = (2, 4, 16, 16)
    yp = jax.random.normal(k[0], shape, dtype=jnp.float32)
    yt = jax.random.normal(k[1], shape, dtype=jnp.float32)
    mp = jax.random.bernoulli(k[2], 0.1, shape)
    mt = jax.random.bernoulli(k[3], 0.1, shape)
    yp_n = jnp.where(mp, jnp.nan, yp)
    yt_n = jnp.where(mt, jnp.nan, yt)
    for mode in ("both", "left", "right"):
        got = allow_nan_mse(yp_n, yt_n, has_nan=mode)
        want = _reference(yp_n, yt_n, has_nan=mode)
        # 'left'/'right' legitimately give NaN here (NaNs remain in the other arg).
        ok &= check(got, want, equal_nan=(mode != "both"))
    ok &= bool(jnp.isfinite(jax.block_until_ready(
        allow_nan_mse(yp_n, yt_n, has_nan="both"))))

    # Case 2: NaNs only on the masked side -> finite results for left/right.
    yp_only = jnp.where(mp, jnp.nan, yp)
    yt_only = jnp.where(mt, jnp.nan, yt)
    ok &= check(allow_nan_mse(yp_only, yt, has_nan="left"),
                _reference(yp_only, yt, has_nan="left"))
    ok &= check(allow_nan_mse(yp, yt_only, has_nan="right"),
                _reference(yp, yt_only, has_nan="right"))

    # Case 3: multi-block grid with a ragged last block (forced tm=32, M=40),
    # exercising the gated edge mask and the 32-row accumulator path.
    shape3 = (5, 8, 16, 8)   # 5120 elements -> M = 40 rows
    yp3 = jax.random.normal(k[4], shape3, dtype=jnp.float32)
    yt3 = jax.random.normal(k[5], shape3, dtype=jnp.float32)
    yp3 = jnp.where(jax.random.bernoulli(k[6], 0.1, shape3), jnp.nan, yp3)
    yt3 = jnp.where(jax.random.bernoulli(k[7], 0.1, shape3), jnp.nan, yt3)
    ok &= check(allow_nan_mse(yp3, yt3, has_nan="both", max_rows=32),
                _reference(yp3, yt3, has_nan="both"))

    # Case 4: total % 128 != 0 (padded tail) and tm not a multiple of 8.
    shape4 = (3, 5, 11, 13)  # 2145 elements
    yp4 = jax.random.normal(k[8], shape4, dtype=jnp.float32)
    yt4 = jax.random.normal(k[9], shape4, dtype=jnp.float32)
    yp4 = jnp.where(jax.random.bernoulli(k[2], 0.1, shape4), jnp.nan, yp4)
    ok &= check(allow_nan_mse(yp4, yt4, has_nan="both"),
                _reference(yp4, yt4, has_nan="both"))

    if ok:
        print("KERNEL_OK")
    else:
        print("KERNEL_MISMATCH")
</pallas_src>

<mosaic_0001>
module attributes {stable_mosaic.version = 11 : i64} {
  func.func @_allow_nan_sq_sum_kernel(%arg0: i32, %arg1: i32, %arg2: memref<16x128xf32, #tpu.memory_space<vmem>>, %arg3: memref<16x128xf32, #tpu.memory_space<vmem>>, %arg4: memref<1x32x128xf32, #tpu.memory_space<vmem>>, %arg5: memref<32x128xf32, #tpu.memory_space<vmem>>) attributes {dimension_semantics = [#tpu.dimension_semantics<arbitrary>, #tpu.dimension_semantics<arbitrary>], iteration_bounds = array<i64: 1, 1>, scalar_prefetch = 0 : i64, scratch_operands = 1 : i64, tpu.core_type = #tpu.core_type<tc>, window_params = [{transform_indices = @transform_0, window_bounds = array<i64: 16, 128>}, {transform_indices = @transform_1, window_bounds = array<i64: 16, 128>}, {transform_indices = @transform_2, window_bounds = array<i64: 1, 32, 128>}]} {
    %c0_i32 = arith.constant 0 : i32
    %0 = arith.cmpi eq, %arg1, %c0_i32 : i32
    %1 = arith.extui %0 : i1 to i32
    %c0_i32_0 = arith.constant 0 : i32
    %2 = arith.cmpi ne, %1, %c0_i32_0 : i32
    scf.if %2 {
      %cst_11 = arith.constant 0.000000e+00 : f32
      %20 = vector.broadcast %cst_11 : f32 to vector<32x128xf32>
      %c0_12 = arith.constant 0 : index
      %c0_13 = arith.constant 0 : index
      %21 = vector.load %arg5[%c0_12, %c0_13] : memref<32x128xf32, #tpu.memory_space<vmem>>, vector<32x128xf32>
      tpu.vector_store %arg5[%c0_12, %c0_13], %20 {strides = array<i32>} : memref<32x128xf32, #tpu.memory_space<vmem>>, vector<32x128xf32>,
    } else {
    }
    %c0 = arith.constant 0 : index
    %c0_1 = arith.constant 0 : index
    %3 = vector.load %arg2[%c0, %c0_1] : memref<16x128xf32, #tpu.memory_space<vmem>>, vector<16x128xf32>
    %c0_2 = arith.constant 0 : index
    %c0_3 = arith.constant 0 : index
    %4 = vector.load %arg3[%c0_2, %c0_3] : memref<16x128xf32, #tpu.memory_space<vmem>>, vector<16x128xf32>
    %5 = arith.cmpf one, %3, %3 : vector<16x128xf32>
    %6 = arith.cmpf one, %4, %4 : vector<16x128xf32>
    %7 = arith.ori %5, %6 : vector<16x128xi1>
    %8 = arith.subf %3, %4 : vector<16x128xf32>
    %cst = arith.constant 0.000000e+00 : f32
    %9 = vector.broadcast %cst : f32 to vector<16x128xf32>
    %10 = arith.select %7, %9, %8 : vector<16x128xi1>, vector<16x128xf32>
    %11 = arith.mulf %10, %10 : vector<16x128xf32>
    %c0_4 = arith.constant 0 : index
    %c0_5 = arith.constant 0 : index
    %12 = vector.load %arg5[%c0_4, %c0_5] : memref<32x128xf32, #tpu.memory_space<vmem>>, vector<8x128xf32>
    %13 = vector.shape_cast %11 : vector<16x128xf32> to vector<2x8x128xf32>
    %cst_6 = arith.constant dense<0.000000e+00> : vector<8x128xf32>
    %14 = vector.multi_reduction <add>, %13, %cst_6 [0] : vector<2x8x128xf32> to vector<8x128xf32>
    %15 = arith.addf %12, %14 : vector<8x128xf32>
    %c0_7 = arith.constant 0 : index
    %c0_8 = arith.constant 0 : index
    %16 = vector.load %arg5[%c0_7, %c0_8] : memref<32x128xf32, #tpu.memory_space<vmem>>, vector<8x128xf32>
    tpu.vector_store %arg5[%c0_7, %c0_8], %15 {strides = array<i32>} : memref<32x128xf32, #tpu.memory_space<vmem>>, vector<8x128xf32>,
    %c0_i32_9 = arith.constant 0 : i32
    %17 = arith.cmpi eq, %arg1, %c0_i32_9 : i32
    %18 = arith.extui %17 : i1 to i32
    %c0_i32_10 = arith.constant 0 : i32
    %19 = arith.cmpi ne, %18, %c0_i32_10 : i32
    scf.if %19 {
      %c0_11 = arith.constant 0 : index
      %c0_12 = arith.constant 0 : index
      %20 = vector.load %arg5[%c0_11, %c0_12] : memref<32x128xf32, #tpu.memory_space<vmem>>, vector<32x128xf32>
      %21 = vector.shape_cast %20 : vector<32x128xf32> to vector<1x32x128xf32>
      %c0_13 = arith.constant 0 : index
      %c0_14 = arith.constant 0 : index
      %c0_15 = arith.constant 0 : index
      %22 = vector.load %arg4[%c0_13, %c0_14, %c0_15] : memref<1x32x128xf32, #tpu.memory_space<vmem>>, vector<1x32x128xf32>
      tpu.vector_store %arg4[%c0_13, %c0_14, %c0_15], %21 {strides = array<i32>} : memref<1x32x128xf32, #tpu.memory_space<vmem>>, vector<1x32x128xf32>,
    } else {
    }
    return
  }
  func.func @transform_0(%arg0: i32, %arg1: i32) -> (i32, i32) {
    %c1_i32 = arith.constant 1 : i32
    %0 = arith.muli %arg0, %c1_i32 : i32
    %1 = arith.addi %0, %arg1 : i32
    %c0_i32 = arith.constant 0 : i32
    %2 = arith.minsi %1, %c0_i32 : i32
    %c0_i32_0 = arith.constant 0 : i32
    %c0_i32_1 = arith.constant 0 : i32
    return %2, %c0_i32_0 : i32, i32
  }
  func.func @transform_1(%arg0: i32, %arg1: i32) -> (i32, i32) {
    %c1_i32 = arith.constant 1 : i32
    %0 = arith.muli %arg0, %c1_i32 : i32
    %1 = arith.addi %0, %arg1 : i32
    %c0_i32 = arith.constant 0 : i32
    %2 = arith.minsi %1, %c0_i32 : i32
    %c0_i32_0 = arith.constant 0 : i32
    %c0_i32_1 = arith.constant 0 : i32
    return %2, %c0_i32_0 : i32, i32
  }
  func.func @transform_2(%arg0: i32, %arg1: i32) -> (i32, i32, i32) {
    %c0_i32 = arith.constant 0 : i32
    %c0_i32_0 = arith.constant 0 : i32
    %c0_i32_1 = arith.constant 0 : i32
    return %arg0, %c0_i32, %c0_i32_0 : i32, i32, i32
  }
}

</mosaic_0001>

<bundles_post_ra>
// kernel: tpu_custom_call.1
= control target key start
LH: loop header
LB: loop body
LE: loop exit
PB: predicated region body
PF: predicated region fallthrough
CT: control target
= control target key end

     0   :  { %7 = vsyncpa [#allocation4], 0  ;;  %s232_s0 = inlined_call_operand.hbm [shape: f32[16,128], index: 0, kind: input, shape index: {}]   ;;  %s233_s1 = inlined_call_operand.hbm [shape: f32[16,128], index: 1, kind: input, shape index: {}]   ;;  %s234_s2 = inlined_call_operand.hbm [shape: f32[1,32,128], index: 2, kind: output, shape index: {}]  }
   0x1   :  { %8 = vsyncpa [#allocation7], 0 }
   0x2   :  { %9 = vsyncpa [#allocation5], 0  ;;  %s193_s9 = smov [#allocation3]  }
   0x3   :  { %s21_s10 = sshll.u32 %s193_s9, 4  ;;  %s22_s10 = int_to_ptr.vmem [resolvable:$true] %s21_s10 }
   0x4   :  { %s135_s11 = scalar_lea.vmem %s22_s10, 256  ;;  %p140_p1 = scmp.lt.s32.totalorder %s22_s10, %s22_s10 }
   0x5   :  { %p136_p0 = scmp.ne.s32.totalorder %s22_s10, %s135_s11  ;;  %p141_p2 = scmp.lt.s32.totalorder %s135_s11, %s135_s11 }
   0x7   :  { %p142_p3 = por %p141_p2, %p140_p1 }
   0x9   :  { %p143_p4 = pnand %p142_p3, %p136_p0 }
   0xb   :  { %146 = shalt.err (!%p143_p4)
}
   0xc   :  { %s194_s12 = smov 128   ;;  %s195_s13 = smov 8  }
   0xd   :  { %27 = dma.hbm_to_vmem [thread:$0]  %s232_s0, 256, %s22_s10, [#allocation4], %s194_s12, %s194_s12, %s195_s13  }
   0xe   :  { %s196_s16 = smov [#allocation6]  }
   0xf   :  { %s39_s17 = sshll.u32 %s196_s16, 4  ;;  %s40_s17 = int_to_ptr.vmem [resolvable:$true] %s39_s17 }
  0x10   :  { %s155_s18 = scalar_lea.vmem %s40_s17, 256  ;;  %p160_p6 = scmp.lt.s32.totalorder %s40_s17, %s40_s17 }
  0x11   :  { %p156_p5 = scmp.ne.s32.totalorder %s40_s17, %s155_s18  ;;  %p161_p7 = scmp.lt.s32.totalorder %s155_s18, %s155_s18 }
  0x13   :  { %p162_p8 = por %p161_p7, %p160_p6 }
  0x15   :  { %p163_p9 = pnand %p162_p8, %p156_p5 }
  0x17   :  { %166 = shalt.err (!%p163_p9)
}
  0x18   :  { %45 = dma.hbm_to_vmem [thread:$0]  %s233_s1, 256, %s40_s17, [#allocation7], %s194_s12, %s194_s12, %s195_s13  }
  0x19   :  { %187 = dma.done.wait [#allocation4], 256  }
  0x1a   :  { %188 = vsyncadd [#allocation4], 4294967040 }
  0x1b   :  { %189 = dma.done.wait [#allocation7], 256  }
  0x1c   :  { %190 = vsyncadd [#allocation7], 4294967040  ;;  %v197_v0 = vmov 0.0   ;;  %v68_v1 = vld [vmem:[#allocation3] sm:$0xff]  ;;  %v69_v2 = vld [vmem:[#allocation3 + $0x8] sm:$0xff]  ;;  %s198_s0 = smov [#allocation8]  }
  0x1d   :  { %96 = vst [vmem:[#allocation8 + $0x8] sm:$0xff] %v197_v0  ;;  %97 = vst [vmem:[#allocation8 + $0x10] sm:$0xff] %v197_v0  ;;  %v70_v3 = vld [vmem:[#allocation6] sm:$0xff]  ;;  %v71_v4 = vld [vmem:[#allocation6 + $0x8] sm:$0xff]  ;;  %vm72_vm0 = vcmp.ne.f32.partialorder %v68_v1, %v68_v1  ;;  %vm73_vm1 = vcmp.ne.f32.partialorder %v69_v2, %v69_v2  ;;  %s104_s1 = sshll.u32 %s198_s0, 4  ;;  %s105_s1 = int_to_ptr.vmem [resolvable:$true] %s104_s1 }
  0x1e   :  { %98 = vst [vmem:[#allocation8 + $0x18] sm:$0xff] %v197_v0  ;;  %vm74_vm2 = vcmp.ne.f32.partialorder %v70_v3, %v70_v3  ;;  %v78_v5 = vsub.f32 %v68_v1, %v70_v3  ;;  %vm75_vm3 = vcmp.ne.f32.partialorder %v71_v4, %v71_v4  ;;  %v79_v6 = vsub.f32 %v69_v2, %v71_v4  ;;  %s167_s21 = scalar_lea.vmem %s105_s1, 512  ;;  %p172_p11 = scmp.lt.s32.totalorder %s105_s1, %s105_s1 }
  0x1f   :  { %vm76_vm4 = vmor %vm72_vm0, %vm74_vm2  ;;  %p168_p10 = scmp.ne.s32.totalorder %s105_s1, %s167_s21  ;;  %p173_p12 = scmp.lt.s32.totalorder %s167_s21, %s167_s21 }
  0x20   :  { %vm77_vm5 = vmor %vm73_vm1, %vm75_vm3  ;;  %v80_v7 = vsel %vm76_vm4, 0.0, %v78_v5 }
  0x21   :  { %v81_v8 = vsel %vm77_vm5, 0.0, %v79_v6  ;;  %v82_v9 = vmul.f32 %v80_v7, %v80_v7  ;;  %p174_p13 = por %p173_p12, %p172_p11 }
  0x22   :  { %v83_v10 = vmul.f32 %v81_v8, %v81_v8 }
  0x23   :  { %p175_p0 = pnand %p174_p13, %p168_p10 }
  0x24   :  { %v85_v11 = vadd.f32 %v83_v10, %v82_v9 }
  0x26   :  { %95 = vst [vmem:[#allocation8] sm:$0xff] %v85_v11 }
  0x27   :  { %178 = shalt.err (!%p175_p0)
}
  0x28   :  { %110 = dma.vmem_to_hbm [thread:$0]  %s105_s1, 512, %s234_s2, [#allocation5], %s194_s12, %s194_s12, %s195_s13  }
  0x29   :  { %191 = dma.done.wait [#allocation5], 512  }
  0x2a   :  { %192 = vsyncadd [#allocation5], 4294966784 }
  0x2b   :  { %114 = vsyncpa [#allocation4], 1 }
  0x2c   :  { %115 = vsyncpa [#allocation7], 1 }
  0x2d   :  { %116 = vsyncpa [#allocation5], 1 }

</bundles_post_ra>
